<compile_context>
chip_gen: v7x
topology: tpu7x:2x2x1
jax: 0.10.0
libtpu: 0.0.40
codegen_flags: <defaults>
</compile_context>

<pallas_src>
import functools

import numpy as np

import jax
import jax.numpy as jnp
from jax.experimental import pallas as pl
from jax.experimental.pallas import tpu as pltpu

_LANE = 128


def _round_up(x, m):
    return ((x + m - 1) // m) * m


def _sublane(dtype):
    # Min second-to-last tile dim: 8 for 32-bit, 16 for 16-bit, 32 for 8-bit.
    return max(8, 32 // np.dtype(dtype).itemsize)


def _vmem_limit_bytes():
    try:
        cap = int(pltpu.get_tpu_info().vmem_capacity_bytes)
    except Exception:
        cap = 64 * 1024 * 1024          # conservative (v7x-sized) fallback
    return min(cap * 3 // 4, 96 * 1024 * 1024)


def _fused_mlp_kernel(x_ref, *refs, num_layers, activation, compute_dtype,
                      transpose_out, out_rows):
    """Push one row tile through every layer: h = activation(h @ W_l + b_l)."""
    o_ref = refs[-1]
    h = x_ref[...]                                   # stored dtype (f32/bf16)
    acc = None
    for layer in range(num_layers):
        w = refs[2 * layer][...]                     # stored dtype
        b = refs[2 * layer + 1][...]                 # f32 (1, n_pad)
        # Exact f32 path for f32 params; native bf16 MXU path otherwise.
        prec = jax.lax.Precision.HIGHEST if h.dtype == jnp.float32 else None
        acc = jnp.dot(h, w, preferred_element_type=jnp.float32,
                      precision=prec) + b
        acc = activation(acc)                        # f32 epilogue
        if layer + 1 < num_layers:
            h = acc.astype(compute_dtype)            # back to MXU input dtype
    if transpose_out:
        # Lane-dense tiny-N writeback: (out_rows, tm) instead of (tm, 128).
        o_ref[...] = jnp.transpose(acc)[:out_rows, :].astype(o_ref.dtype)
    else:
        o_ref[...] = acc.astype(o_ref.dtype)


def prepare_mlp_params(params, compute_dtype=jnp.float32):
    """Pad/cast params ONCE (hoisted out of the per-call path).

    Each layer's output dim (and deeper layers' input dims) is zero-padded to a
    multiple of 128 lanes.  Weights are stored in `compute_dtype`; biases stay
    f32 because the bias-add/activation epilogue runs in f32.
    """
    layers = []
    for idx, (w, b) in enumerate(params):
        k_in, n_out = w.shape
        k_pad = k_in if idx == 0 else _round_up(k_in, _LANE)
        n_pad = _round_up(n_out, _LANE)
        w_p = jnp.zeros((k_pad, n_pad), compute_dtype).at[:k_in, :n_out].set(
            jnp.asarray(w).astype(compute_dtype))
        b_p = jnp.zeros((1, n_pad), jnp.float32).at[:, :n_out].set(
            jnp.asarray(b, jnp.float32).reshape(1, -1))
        layers.append((w_p, b_p))
    return {
        "layers": layers,
        "n_out": int(params[-1][0].shape[1]),
        "compute_dtype": np.dtype(compute_dtype),
    }


def mlp_forward(x, prepared, activation=lambda v: v, *, tm=1024):
    """Matches MLP.forward: x -> activation(x @ W + b) per layer, any leading dims.

    NOTE: exact only for elementwise activations (the zero-padded feature lanes
    would be visible to axis-mixing activations such as softmax).
    """
    layers = prepared["layers"]
    n_last = prepared["n_out"]
    compute_dtype = prepared["compute_dtype"]
    num_layers = len(layers)

    out_dtype = x.dtype
    lead_shape = x.shape[:-1]
    k0 = x.shape[-1]
    x2d = x.reshape(-1, k0).astype(compute_dtype)
    m = x2d.shape[0]
    n_last_pad = layers[-1][0].shape[1]

    in_sub = _sublane(compute_dtype)
    out_sub = _sublane(out_dtype)
    out_rows = _round_up(n_last, out_sub)
    # Tiny final layer -> transposed writeback (M on the lane axis) to avoid
    # paying 128 padded lanes of HBM writeback per row.
    transpose_out = 2 * out_rows <= n_last_pad

    # --- row-tile selection (dtype-aware sublane granularity) ---------------
    gran = max(in_sub, out_sub)
    tm_eff = _round_up(min(tm, _round_up(m, gran)), gran)
    # Keep >=2 grid steps when there is enough work so v7x megacore can split
    # the (parallel) row axis across both TensorCores.
    if _round_up(m, gran) <= tm_eff and m >= 256:
        tm_eff = _round_up(-(-m // 2), gran)

    # Wrapper-side VMEM feasibility: resident weights (single-buffered) +
    # double-buffered x/out tiles + per-layer f32 intermediates.
    vmem_limit = _vmem_limit_bytes()

    def _vmem_usage(tm_rows):
        wb = sum(w.size * w.dtype.itemsize + b.size * b.dtype.itemsize
                 for w, b in layers)
        x_bytes = 2 * tm_rows * k0 * np.dtype(compute_dtype).itemsize
        if transpose_out:
            out_bytes = 2 * out_rows * tm_rows * np.dtype(out_dtype).itemsize
        else:
            out_bytes = 2 * tm_rows * n_last_pad * np.dtype(out_dtype).itemsize
        inter = sum(tm_rows * w.shape[1] * 4 for w, _ in layers)
        return wb + x_bytes + out_bytes + inter

    while tm_eff > gran and _vmem_usage(tm_eff) > int(0.8 * vmem_limit):
        tm_eff = max(gran, _round_up(tm_eff // 2, gran))
    # TODO(synk): for very large layer dims where resident weights alone exceed
    # VMEM, fall back to a K/N-tiled per-layer grid instead of shrinking tm.

    m_pad = _round_up(m, tm_eff)
    if transpose_out and m_pad // tm_eff > 1 and tm_eff % _LANE != 0:
        tm_eff = _round_up(tm_eff, _LANE)   # tm sits on the output lane axis
        m_pad = _round_up(m, tm_eff)
    grid_steps = m_pad // tm_eff

    if m_pad != m:
        x2d = jnp.pad(x2d, ((0, m_pad - m), (0, 0)))

    kernel = functools.partial(
        _fused_mlp_kernel, num_layers=num_layers, activation=activation,
        compute_dtype=compute_dtype, transpose_out=transpose_out,
        out_rows=out_rows)

    if transpose_out:
        out_shape = jax.ShapeDtypeStruct((out_rows, m_pad), out_dtype)
        out_spec = pl.BlockSpec((out_rows, tm_eff), lambda i: (0, i))
        out_elems = out_rows * m_pad
    else:
        out_shape = jax.ShapeDtypeStruct((m_pad, n_last_pad), out_dtype)
        out_spec = pl.BlockSpec((tm_eff, n_last_pad), lambda i: (i, 0))
        out_elems = m_pad * n_last_pad

    flat_wb = []
    for w_p, b_p in layers:
        flat_wb.extend((w_p, b_p))

    # Advisory cost estimate on the padded shapes actually executed.
    flops = sum(2 * m_pad * w.shape[0] * w.shape[1] for w, _ in layers)
    bytes_accessed = (
        x2d.size * x2d.dtype.itemsize
        + out_elems * np.dtype(out_dtype).itemsize
        + sum(w.size * w.dtype.itemsize + b.size * b.dtype.itemsize
              for w, b in layers))
    cost = pl.CostEstimate(flops=flops, transcendentals=0,
                           bytes_accessed=bytes_accessed)

    def _run(single_buffer_weights):
        wb_kwargs = ({"pipeline_mode": pl.Buffered(1)}
                     if single_buffer_weights else {})
        in_specs = [pl.BlockSpec((tm_eff, k0), lambda i: (i, 0))]
        for w_p, b_p in layers:
            in_specs.append(
                pl.BlockSpec(w_p.shape, lambda i: (0, 0), **wb_kwargs))
            in_specs.append(
                pl.BlockSpec(b_p.shape, lambda i: (0, 0), **wb_kwargs))
        return pl.pallas_call(
            kernel,
            out_shape=out_shape,
            grid_spec=pltpu.PrefetchScalarGridSpec(
                num_scalar_prefetch=0,
                grid=(grid_steps,),
                in_specs=in_specs,
                out_specs=out_spec,
            ),
            compiler_params=pltpu.CompilerParams(
                dimension_semantics=("parallel",),   # row tiles split across TCs
                vmem_limit_bytes=vmem_limit,
            ),
            cost_estimate=cost,
        )(x2d, *flat_wb)

    try:
        out = _run(True)            # resident weights single-buffered
    except Exception:
        out = _run(False)           # fall back to default pipelining

    if transpose_out:
        out2d = out[:n_last, :m].T
    else:
        out2d = out[:m, :n_last]
    return out2d.reshape(*lead_shape, n_last)


def init_mlp_params(key, dims, dtype=jnp.float32):
    """Deterministic synthetic params. Weights stored as (dim_in, dim_out)."""
    params = []
    for dim_in, dim_out in zip(dims[:-1], dims[1:]):
        key, kw, kb = jax.random.split(key, 3)
        bound = 1.0 / float(np.sqrt(dim_in))   # torch.nn.Linear default range
        w = jax.random.uniform(kw, (dim_in, dim_out), dtype, -bound, bound)
        b = jax.random.uniform(kb, (1, dim_out), dtype, -bound, bound)
        params.append((w, b))
    return params


if __name__ == "__main__":
    key = jax.random.PRNGKey(0)
    k_x, k_p, k_x2 = jax.random.split(key, 3)

    dims = (16, 32, 8)              # like MLP(dims=(16, 32, 8))
    params = init_mlp_params(k_p, dims)

    # Prepare (pad + cast) params ONCE, outside the forward path.
    prep_f32 = prepare_mlp_params(params, jnp.float32)
    prep_bf16 = prepare_mlp_params(params, jnp.bfloat16)

    # Host-side float64 references.
    def ref_mlp(x_np, act):
        h = np.asarray(x_np, np.float64).reshape(-1, dims[0])
        for w, b in params:
            h = act(h @ np.asarray(w, np.float64) + np.asarray(b, np.float64))
        return h

    # Case 1: default module activation (identity), small M, single tile.
    x = jax.random.normal(k_x, (2, 8, dims[0]), dtype=jnp.float32)
    out = jax.block_until_ready(mlp_forward(x, prep_f32))
    ref = ref_mlp(x, lambda v: v).reshape(2, 8, dims[-1])
    assert out.shape == (2, 8, dims[-1])
    assert np.allclose(np.asarray(out, np.float64), ref, atol=1e-4, rtol=1e-4)

    # Case 2: row count not divisible by the tile (multi-step grid) + relu.
    x2 = jax.random.normal(k_x2, (3, 100, dims[0]), dtype=jnp.float32)
    out2 = jax.block_until_ready(
        mlp_forward(x2, prep_f32, activation=jax.nn.relu))
    ref2 = ref_mlp(x2, lambda v: np.maximum(v, 0.0)).reshape(3, 100, dims[-1])
    assert out2.shape == (3, 100, dims[-1])
    assert np.allclose(np.asarray(out2, np.float64), ref2, atol=1e-4, rtol=1e-4)

    # Case 3: bf16 streaming path (x + weights bf16, f32 accumulation).
    x3 = x2.astype(jnp.bfloat16)
    out3 = jax.block_until_ready(
        mlp_forward(x3, prep_bf16, activation=jax.nn.relu))
    assert out3.shape == (3, 100, dims[-1])
    assert out3.dtype == jnp.bfloat16
    assert np.allclose(np.asarray(out3, np.float64), ref2, atol=1e-1, rtol=1e-1)

    print("KERNEL_OK")
</pallas_src>

<mosaic_0001>
module attributes {stable_mosaic.version = 11 : i64} {
  func.func @_fused_mlp_kernel(%arg0: i32, %arg1: memref<16x16xf32, #tpu.memory_space<vmem>>, %arg2: memref<16x128xf32, #tpu.memory_space<vmem>>, %arg3: memref<1x128xf32, #tpu.memory_space<vmem>>, %arg4: memref<128x128xf32, #tpu.memory_space<vmem>>, %arg5: memref<1x128xf32, #tpu.memory_space<vmem>>, %arg6: memref<8x16xf32, #tpu.memory_space<vmem>>) attributes {dimension_semantics = [#tpu.dimension_semantics<parallel>], iteration_bounds = array<i64: 1>, scalar_prefetch = 0 : i64, scratch_operands = 0 : i64, tpu.core_type = #tpu.core_type<tc>, window_params = [{transform_indices = @transform_0, window_bounds = array<i64: 16, 16>}, {pipeline_mode = #tpu.pipeline_mode<synchronous>, transform_indices = @transform_1, window_bounds = array<i64: 16, 128>}, {pipeline_mode = #tpu.pipeline_mode<synchronous>, transform_indices = @transform_2, window_bounds = array<i64: 1, 128>}, {pipeline_mode = #tpu.pipeline_mode<synchronous>, transform_indices = @transform_3, window_bounds = array<i64: 128, 128>}, {pipeline_mode = #tpu.pipeline_mode<synchronous>, transform_indices = @transform_4, window_bounds = array<i64: 1, 128>}, {transform_indices = @transform_5, window_bounds = array<i64: 8, 16>}]} {
    %c0 = arith.constant 0 : index
    %c0_0 = arith.constant 0 : index
    %0 = vector.load %arg1[%c0, %c0_0] : memref<16x16xf32, #tpu.memory_space<vmem>>, vector<16x16xf32>
    %c0_1 = arith.constant 0 : index
    %c0_2 = arith.constant 0 : index
    %1 = vector.load %arg2[%c0_1, %c0_2] : memref<16x128xf32, #tpu.memory_space<vmem>>, vector<16x128xf32>
    %c0_3 = arith.constant 0 : index
    %c0_4 = arith.constant 0 : index
    %2 = vector.load %arg3[%c0_3, %c0_4] : memref<1x128xf32, #tpu.memory_space<vmem>>, vector<1x128xf32>
    %cst = arith.constant dense<0.000000e+00> : vector<16x128xf32>
    %3 = tpu.matmul %0, %1, %cst {dimension_numbers = #tpu.dot_dimension_numbers<[1], [0], [0], [1], [0, 0, 1, 1], [], []>, precision = #tpu.contract_precision<fp32>} : vector<16x16xf32>, vector<16x128xf32>, vector<16x128xf32> -> vector<16x128xf32>
    %4 = vector.broadcast %2 : vector<1x128xf32> to vector<16x128xf32>
    %5 = arith.addf %3, %4 : vector<16x128xf32>
    %c0_5 = arith.constant 0 : index
    %c0_6 = arith.constant 0 : index
    %6 = vector.load %arg4[%c0_5, %c0_6] : memref<128x128xf32, #tpu.memory_space<vmem>>, vector<128x128xf32>
    %c0_7 = arith.constant 0 : index
    %c0_8 = arith.constant 0 : index
    %7 = vector.load %arg5[%c0_7, %c0_8] : memref<1x128xf32, #tpu.memory_space<vmem>>, vector<1x128xf32>
    %cst_9 = arith.constant dense<0.000000e+00> : vector<16x128xf32>
    %8 = tpu.matmul %5, %6, %cst_9 {dimension_numbers = #tpu.dot_dimension_numbers<[1], [0], [0], [1], [0, 0, 1, 1], [], []>, precision = #tpu.contract_precision<fp32>} : vector<16x128xf32>, vector<128x128xf32>, vector<16x128xf32> -> vector<16x128xf32>
    %9 = vector.broadcast %7 : vector<1x128xf32> to vector<16x128xf32>
    %10 = arith.addf %8, %9 : vector<16x128xf32>
    %11 = tpu.transpose %10, [1, 0] : vector<16x128xf32> -> vector<128x16xf32>
    %12 = vector.extract_strided_slice %11 {offsets = [0, 0], sizes = [8, 16], strides = [1, 1]} : vector<128x16xf32> to vector<8x16xf32>
    %c0_10 = arith.constant 0 : index
    %c0_11 = arith.constant 0 : index
    %13 = vector.load %arg6[%c0_10, %c0_11] : memref<8x16xf32, #tpu.memory_space<vmem>>, vector<8x16xf32>
    tpu.vector_store %arg6[%c0_10, %c0_11], %12 {strides = array<i32>} : memref<8x16xf32, #tpu.memory_space<vmem>>, vector<8x16xf32>,
    return
  }
  func.func @transform_0(%arg0: i32) -> (i32, i32) {
    %c0_i32 = arith.constant 0 : i32
    %c0_i32_0 = arith.constant 0 : i32
    return %arg0, %c0_i32 : i32, i32
  }
  func.func @transform_1(%arg0: i32) -> (i32, i32) {
    %c0_i32 = arith.constant 0 : i32
    %c0_i32_0 = arith.constant 0 : i32
    %c0_i32_1 = arith.constant 0 : i32
    return %c0_i32, %c0_i32_0 : i32, i32
  }
  func.func @transform_2(%arg0: i32) -> (i32, i32) {
    %c0_i32 = arith.constant 0 : i32
    %c0_i32_0 = arith.constant 0 : i32
    %c0_i32_1 = arith.constant 0 : i32
    return %c0_i32, %c0_i32_0 : i32, i32
  }
  func.func @transform_3(%arg0: i32) -> (i32, i32) {
    %c0_i32 = arith.constant 0 : i32
    %c0_i32_0 = arith.constant 0 : i32
    %c0_i32_1 = arith.constant 0 : i32
    return %c0_i32, %c0_i32_0 : i32, i32
  }
  func.func @transform_4(%arg0: i32) -> (i32, i32) {
    %c0_i32 = arith.constant 0 : i32
    %c0_i32_0 = arith.constant 0 : i32
    %c0_i32_1 = arith.constant 0 : i32
    return %c0_i32, %c0_i32_0 : i32, i32
  }
  func.func @transform_5(%arg0: i32) -> (i32, i32) {
    %c0_i32 = arith.constant 0 : i32
    %c0_i32_0 = arith.constant 0 : i32
    return %c0_i32, %arg0 : i32, i32
  }
}

module attributes {stable_mosaic.version = 11 : i64} {
  func.func @_fused_mlp_kernel(%arg0: i32, %arg1: memref<16x16xf32, #tpu.memory_space<vmem>>, %arg2: memref<16x128xf32, #tpu.memory_space<vmem>>, %arg3: memref<1x128xf32, #tpu.memory_space<vmem>>, %arg4: memref<128x128xf32, #tpu.memory_space<vmem>>, %arg5: memref<1x128xf32, #tpu.memory_space<vmem>>, %arg6: memref<8x16xf32, #tpu.memory_space<vmem>>) attributes {dimension_semantics = [#tpu.dimension_semantics<parallel>], iteration_bounds = array<i64: 1>, scalar_prefetch = 0 : i64, scratch_operands = 0 : i64, tpu.core_type = #tpu.core_type<tc>, window_params = [{transform_indices = @transform_0, window_bounds = array<i64: 16, 16>}, {pipeline_mode = #tpu.pipeline_mode<synchronous>, transform_indices = @transform_1, window_bounds = array<i64: 16, 128>}, {pipeline_mode = #tpu.pipeline_mode<synchronous>, transform_indices = @transform_2, window_bounds = array<i64: 1, 128>}, {pipeline_mode = #tpu.pipeline_mode<synchronous>, transform_indices = @transform_3, window_bounds = array<i64: 128, 128>}, {pipeline_mode = #tpu.pipeline_mode<synchronous>, transform_indices = @transform_4, window_bounds = array<i64: 1, 128>}, {transform_indices = @transform_5, window_bounds = array<i64: 8, 16>}]} {
    %c0 = arith.constant 0 : index
    %c0_0 = arith.constant 0 : index
    %0 = vector.load %arg1[%c0, %c0_0] : memref<16x16xf32, #tpu.memory_space<vmem>>, vector<16x16xf32>
    %c0_1 = arith.constant 0 : index
    %c0_2 = arith.constant 0 : index
    %1 = vector.load %arg2[%c0_1, %c0_2] : memref<16x128xf32, #tpu.memory_space<vmem>>, vector<16x128xf32>
    %c0_3 = arith.constant 0 : index
    %c0_4 = arith.constant 0 : index
    %2 = vector.load %arg3[%c0_3, %c0_4] : memref<1x128xf32, #tpu.memory_space<vmem>>, vector<1x128xf32>
    %cst = arith.constant dense<0.000000e+00> : vector<16x128xf32>
    %3 = tpu.matmul %0, %1, %cst {dimension_numbers = #tpu.dot_dimension_numbers<[1], [0], [0], [1], [0, 0, 1, 1], [], []>, precision = #tpu.contract_precision<fp32>} : vector<16x16xf32>, vector<16x128xf32>, vector<16x128xf32> -> vector<16x128xf32>
    %4 = vector.broadcast %2 : vector<1x128xf32> to vector<16x128xf32>
    %5 = arith.addf %3, %4 : vector<16x128xf32>
    %c0_5 = arith.constant 0 : index
    %c0_6 = arith.constant 0 : index
    %6 = vector.load %arg4[%c0_5, %c0_6] : memref<128x128xf32, #tpu.memory_space<vmem>>, vector<128x128xf32>
    %c0_7 = arith.constant 0 : index
    %c0_8 = arith.constant 0 : index
    %7 = vector.load %arg5[%c0_7, %c0_8] : memref<1x128xf32, #tpu.memory_space<vmem>>, vector<1x128xf32>
    %cst_9 = arith.constant dense<0.000000e+00> : vector<16x128xf32>
    %8 = tpu.matmul %5, %6, %cst_9 {dimension_numbers = #tpu.dot_dimension_numbers<[1], [0], [0], [1], [0, 0, 1, 1], [], []>, precision = #tpu.contract_precision<fp32>} : vector<16x128xf32>, vector<128x128xf32>, vector<16x128xf32> -> vector<16x128xf32>
    %9 = vector.broadcast %7 : vector<1x128xf32> to vector<16x128xf32>
    %10 = arith.addf %8, %9 : vector<16x128xf32>
    %11 = tpu.transpose %10, [1, 0] : vector<16x128xf32> -> vector<128x16xf32>
    %12 = vector.extract_strided_slice %11 {offsets = [0, 0], sizes = [8, 16], strides = [1, 1]} : vector<128x16xf32> to vector<8x16xf32>
    %c0_10 = arith.constant 0 : index
    %c0_11 = arith.constant 0 : index
    %13 = vector.load %arg6[%c0_10, %c0_11] : memref<8x16xf32, #tpu.memory_space<vmem>>, vector<8x16xf32>
    tpu.vector_store %arg6[%c0_10, %c0_11], %12 {strides = array<i32>} : memref<8x16xf32, #tpu.memory_space<vmem>>, vector<8x16xf32>,
    return
  }
  func.func @transform_0(%arg0: i32) -> (i32, i32) {
    %c0_i32 = arith.constant 0 : i32
    %c0_i32_0 = arith.constant 0 : i32
    return %arg0, %c0_i32 : i32, i32
  }
  func.func @transform_1(%arg0: i32) -> (i32, i32) {
    %c0_i32 = arith.constant 0 : i32
    %c0_i32_0 = arith.constant 0 : i32
    %c0_i32_1 = arith.constant 0 : i32
    return %c0_i32, %c0_i32_0 : i32, i32
  }
  func.func @transform_2(%arg0: i32) -> (i32, i32) {
    %c0_i32 = arith.constant 0 : i32
    %c0_i32_0 = arith.constant 0 : i32
    %c0_i32_1 = arith.constant 0 : i32
    return %c0_i32, %c0_i32_0 : i32, i32
  }
  func.func @transform_3(%arg0: i32) -> (i32, i32) {
    %c0_i32 = arith.constant 0 : i32
    %c0_i32_0 = arith.constant 0 : i32
    %c0_i32_1 = arith.constant 0 : i32
    return %c0_i32, %c0_i32_0 : i32, i32
  }
  func.func @transform_4(%arg0: i32) -> (i32, i32) {
    %c0_i32 = arith.constant 0 : i32
    %c0_i32_0 = arith.constant 0 : i32
    %c0_i32_1 = arith.constant 0 : i32
    return %c0_i32, %c0_i32_0 : i32, i32
  }
  func.func @transform_5(%arg0: i32) -> (i32, i32) {
    %c0_i32 = arith.constant 0 : i32
    %c0_i32_0 = arith.constant 0 : i32
    return %c0_i32, %arg0 : i32, i32
  }
}

</mosaic_0001>

<bundles_post_ra>
// kernel: tpu_custom_call.1
= control target key start
LH: loop header
LB: loop body
LE: loop exit
PB: predicated region body
PF: predicated region fallthrough
CT: control target
= control target key end

     0   :  { %10 = vsyncpa [#allocation3], 0  ;;  %s2414_s0 = inlined_call_operand.hbm [shape: f32[16,16], index: 0, kind: input, shape index: {}]   ;;  %s2415_s1 = inlined_call_operand.hbm [shape: f32[16,128], index: 1, kind: input, shape index: {}]   ;;  %s2416_s2 = inlined_call_operand.vmem [shape: f32[1,128], index: 2, kind: input, shape index: {}]   ;;  %s2417_s3 = inlined_call_operand.hbm [shape: f32[128,128], index: 3, kind: input, shape index: {}]   ;;  %s2418_s4 = inlined_call_operand.vmem [shape: f32[1,128], index: 4, kind: input, shape index: {}]   ;;  %s2419_s5 = inlined_call_operand.hbm [shape: f32[8,16], index: 5, kind: output, shape index: {}]  }
   0x1   :  { %11 = vsyncpa [#allocation6], 0 }
   0x2   :  { %12 = vsyncpa [#allocation4], 0  ;;  %s2065_s18 = smov [#allocation5]   ;;  %s2066_s20 = smov [#allocation2]  }
   0x3   :  { %s30_s19 = sshll.u32 %s2065_s18, 4  ;;  %s18_s21 = sshll.u32 %s2066_s20, 4  ;;  %s31_s19 = int_to_ptr.vmem [resolvable:$true] %s30_s19  ;;  %s2101_s21 = int_to_ptr.vmem [resolvable:$true] %s18_s21 }
   0x4   :  { %s1971_s24 = scalar_lea.hbm %s2415_s1, 256 }
   0x5   :  { %p1972_p0 = scmp.ne.s32.totalorder %s2415_s1, %s1971_s24  ;;  %p1975_p1 = scmp.lt.u32.totalorder %s1971_s24, %s2415_s1 }
   0x7   :  { %p1977_p2 = pnand %p1975_p1, %p1972_p0 }
   0x9   :  { %1980 = shalt.err (!%p1977_p2)
}
   0xa   :  { %s1981_s29 = scalar_lea.vmem %s31_s19, 256  ;;  %p1986_p4 = scmp.lt.s32.totalorder %s31_s19, %s31_s19 }
   0xb   :  { %p1982_p3 = scmp.ne.s32.totalorder %s31_s19, %s1981_s29  ;;  %p1987_p5 = scmp.lt.s32.totalorder %s1981_s29, %s1981_s29 }
   0xd   :  { %p1988_p6 = por %p1987_p5, %p1986_p4 }
   0xf   :  { %p1989_p7 = pnand %p1988_p6, %p1982_p3 }
  0x11   :  { %1992 = shalt.err (!%p1989_p7)
}
  0x12   :  { %s2067_s30 = smov 128   ;;  %s2068_s6 = smov 8  }
  0x13   :  { %36 = dma.hbm_to_vmem [thread:$0]  %s2415_s1, 256, %s31_s19, [#allocation6], %s2067_s30, %s2067_s30, %s2068_s6  }
  0x14   :  { %s1993_s11 = scalar_lea.hbm %s2414_s0, 256 }
  0x15   :  { %p1994_p8 = scmp.ne.s32.totalorder %s2414_s0, %s1993_s11  ;;  %p1997_p9 = scmp.lt.u32.totalorder %s1993_s11, %s2414_s0 }
  0x17   :  { %p1999_p10 = pnand %p1997_p9, %p1994_p8 }
  0x19   :  { %2002 = shalt.err (!%p1999_p10)
}
  0x1a   :  { %s2003_s16 = scalar_lea.vmem %s2101_s21, 256  ;;  %p2008_p12 = scmp.lt.s32.totalorder %s2101_s21, %s2101_s21 }
  0x1b   :  { %p2004_p11 = scmp.ne.s32.totalorder %s2101_s21, %s2003_s16  ;;  %p2009_p13 = scmp.lt.s32.totalorder %s2003_s16, %s2003_s16 }
  0x1d   :  { %p2010_p0 = por %p2009_p13, %p2008_p12 }
  0x1f   :  { %p2011_p1 = pnand %p2010_p0, %p2004_p11 }
  0x21   :  { %2014 = shalt.err (!%p2011_p1)
}
  0x22   :  { %24 = dma.hbm_to_vmem [thread:$0]  %s2414_s0, 256, %s2101_s21, [#allocation3], %s2067_s30, %s2067_s30, %s2068_s6  }
  0x23   :  { %s2069_s18 = smov [#allocation7]   ;;  %s2015_s23 = scalar_lea.hbm %s2417_s3, 2048 }
  0x24   :  { %s44_s19 = sshll.u32 %s2069_s18, 4  ;;  %p2016_p2 = scmp.ne.s32.totalorder %s2417_s3, %s2015_s23  ;;  %s45_s19 = int_to_ptr.vmem [resolvable:$true] %s44_s19 }
  0x25   :  { %p2019_p3 = scmp.lt.u32.totalorder %s2015_s23, %s2417_s3 }
  0x27   :  { %p2021_p4 = pnand %p2019_p3, %p2016_p2 }
  0x29   :  { %2024 = shalt.err (!%p2021_p4)
}
  0x2a   :  { %s2025_s28 = scalar_lea.vmem %s45_s19, 2048  ;;  %p2030_p6 = scmp.lt.s32.totalorder %s45_s19, %s45_s19 }
  0x2b   :  { %p2026_p5 = scmp.ne.s32.totalorder %s45_s19, %s2025_s28  ;;  %p2031_p7 = scmp.lt.s32.totalorder %s2025_s28, %s2025_s28 }
  0x2d   :  { %p2032_p8 = por %p2031_p7, %p2030_p6 }
  0x2f   :  { %p2033_p9 = pnand %p2032_p8, %p2026_p5 }
  0x31   :  { %2036 = shalt.err (!%p2033_p9)
}
  0x32   :  { %50 = dma.hbm_to_vmem [thread:$0]  %s2417_s3, 2048, %s45_s19, [#allocation6], %s2067_s30, %s2067_s30, %s2068_s6  }
  0x33   :  { %2059 = dma.done.wait [#allocation3], 256  }
  0x34   :  { %2060 = vsyncadd [#allocation3], 4294967040 }
  0x35   :  { %2061 = dma.done.wait [#allocation6], 2304  }
  0x36   :  { %2062 = vsyncadd [#allocation6], 4294964992  ;;  %vm73_vm0 = vcmask 130048   ;;  %v64_v0 = vld [vmem:[#allocation5] sm:$0xff]  ;;  %v65_v1 = vld [vmem:[#allocation5 + $0x8] sm:$0xff]  ;;  %s2070_s6 = smov [#allocation8]  }
  0x37   :  { %v62_v2 = vld [vmem:[#allocation2] sm:$0xff]  ;;  %v81_v3 = vand.u32 4294901760, %v64_v0  ;;  %v84_v4 = vand.u32 4294901760, %v65_v1  ;;  %v63_v6 = vld [vmem:[#allocation2 + $0x8] sm:$0xff]  ;;  %v2167_v35 = vld [vmem:[#allocation7 + $0x10] sm:$0xff]  ;;  %s1328_s7 = sshll.u32 %s2070_s6, 4  ;;  %s1329_s7 = int_to_ptr.vmem [resolvable:$true] %s1328_s7 }
  0x38   :  { %v75_v5 = vsel %vm73_vm0, %v62_v2, 0  ;;  %v78_v8 = vsel %vm73_vm0, %v63_v6, 0  ;;  %v2155_v27 = vld [vmem:[#allocation7] sm:$0xff]  ;;  %v2157_v28 = vld [vmem:[#allocation7 + $0x8] sm:$0xff]  ;;  %v2169_v36 = vld [vmem:[#allocation7 + $0x18] sm:$0xff]  ;;  %v612_v37 = vand.u32 4294901760, %v2167_v35  ;;  %p2042_p11 = scmp.lt.s32.totalorder %s1329_s7, %s1329_s7 }
  0x39   :  { %v147_v7 = vand.u32 4294901760, %v75_v5  ;;  %v1724_v9 = vpack.c.bf16 %v84_v4, %v81_v3  ;;  %v157_v10 = vand.u32 4294901760, %v78_v8  ;;  %v169_v11 = vsub.f32 %v64_v0, %v81_v3  ;;  %v2174_v39 = vld [vmem:[#allocation7 + $0x20] sm:$0xff]  ;;  %v2176_v40 = vld [vmem:[#allocation7 + $0x28] sm:$0xff]  ;;  %v2188_v44 = vld [vmem:[#allocation7 + $0x30] sm:$0xff]  ;;  %s2037_s8 = scalar_lea.vmem %s1329_s7, 128 }
  0x3a   :  { %v176_v12 = vsub.f32 %v65_v1, %v84_v4  ;;  %v606_v32 = vand.u32 4294901760, %v2155_v27  ;;  %v609_v33 = vand.u32 4294901760, %v2157_v28  ;;  %v615_v38 = vand.u32 4294901760, %v2169_v36  ;;  %v2190_v45 = vld [vmem:[#allocation7 + $0x38] sm:$0xff]  ;;  %v590_v50 = vld [vmem:[#allocation7 + $0x40] sm:$0xff]  ;;  %v591_v51 = vld [vmem:[#allocation7 + $0x48] sm:$0xff]  ;;  %p2038_p10 = scmp.ne.s32.totalorder %s1329_s7, %s2037_s8  ;;  %p2043_p12 = scmp.lt.s32.totalorder %s2037_s8, %s2037_s8 }
  0x3b   :  { %v148_v13 = vsub.f32 %v75_v5, %v147_v7  ;;  %1737 = vmatprep.subr.bf16.mxu0 %v1724_v9  ;;  %1725 = vmatprep.subr.bf16.mxu1 %v1724_v9  ;;  %v158_v14 = vsub.f32 %v78_v8, %v157_v10  ;;  %v170_v15 = vand.u32 4294901760, %v169_v11  ;;  %v618_v42 = vand.u32 4294901760, %v2174_v39  ;;  %v592_v55 = vld [vmem:[#allocation7 + $0x50] sm:$0xff]  ;;  %v593_v56 = vld [vmem:[#allocation7 + $0x58] sm:$0xff]  ;;  %v594_v60 = vld [vmem:[#allocation7 + $0x60] sm:$0xff] }
  0x3c   :  { %v177_v16 = vand.u32 4294901760, %v176_v12  ;;  %1739 = vmatpush3.bf16.msra.mxu0 %v1724_v9  ;;  %1727 = vmatpush3.bf16.msra.mxu1 %v1724_v9  ;;  %v1732_v31 = vpack.c.bf16 %v176_v12, %v169_v11  ;;  %v2165_v34 = vpack.c.bf16 %v609_v33, %v606_v32  ;;  %v2183_v41 = vpack.c.bf16 %v615_v38, %v612_v37  ;;  %v595_v61 = vld [vmem:[#allocation7 + $0x68] sm:$0xff]  ;;  %v596_v1 = vld [vmem:[#allocation7 + $0x70] sm:$0xff]  ;;  %v597_v2 = vld [vmem:[#allocation7 + $0x78] sm:$0xff]  ;;  %p2044_p13 = por %p2043_p12, %p2042_p11 }
  0x3d   :  { %v149_v17 = vand.u32 4294901760, %v148_v13  ;;  %v159_v18 = vand.u32 4294901760, %v158_v14  ;;  %v171_v19 = vsub.f32 %v169_v11, %v170_v15  ;;  %v621_v43 = vand.u32 4294901760, %v2176_v40 }
  0x3e   :  { %v178_v20 = vsub.f32 %v176_v12, %v177_v16  ;;  %v1740_v21 = vpack.c.bf16 %v177_v16, %v170_v15  ;;  %v624_v47 = vand.u32 4294901760, %v2188_v44  ;;  %v627_v48 = vand.u32 4294901760, %v2190_v45  ;;  %p2045_p0 = pnand %p2044_p13, %p2038_p10 }
  0x3f   :  { %1497 = vmatprep.mubr.f32.mxu0 %v149_v17  ;;  %v150_v22 = vsub.f32 %v148_v13, %v149_v17  ;;  %v160_v23 = vsub.f32 %v158_v14, %v159_v18  ;;  %v172_v24 = vand.u32 4294901760, %v171_v19  ;;  %v2197_v46 = vpack.c.bf16 %v621_v43, %v618_v42 }
  0x40   :  { %1498 = vmatmul.mubr.f32.vlgmr.msra.gmra.mrb[0].mxu0 %v159_v18  ;;  %v179_v25 = vand.u32 4294901760, %v178_v20  ;;  %1741 = vmatprep.subr.bf16.mxu0 %v1740_v21  ;;  %v2209_v49 = vpack.c.bf16 %v627_v48, %v624_v47  ;;  %v630_v52 = vand.u32 4294901760, %v590_v50  ;;  %v633_v53 = vand.u32 4294901760, %v591_v51 }
  0x41   :  { %v151_v26 = vand.u32 4294901760, %v150_v22  ;;  %1743 = vmatpush3.bf16.msra.mxu0 %v1740_v21  ;;  %1504 = vmatprep.mubr.f32.mxu0 %v147_v7  ;;  %v161_v29 = vand.u32 4294901760, %v160_v23  ;;  %v636_v57 = vand.u32 4294901760, %v592_v55  ;;  %v639_v58 = vand.u32 4294901760, %v593_v56 }
  0x42   :  { %v1728_v30 = vpack.c.bf16 %v179_v25, %v172_v24  ;;  %1745 = vmatprep.subr.bf16.mxu0 %v1724_v9  ;;  %v2219_v54 = vpack.c.bf16 %v633_v53, %v630_v52  ;;  %v642_v62 = vand.u32 4294901760, %v594_v60  ;;  %v645_v63 = vand.u32 4294901760, %v595_v61 }
  0x43   :  { %1476 = vmatprep.mubr.f32.mxu1 %v151_v26  ;;  %v2225_v59 = vpack.c.bf16 %v639_v58, %v636_v57  ;;  %v648_v3 = vand.u32 4294901760, %v596_v1  ;;  %v651_v4 = vand.u32 4294901760, %v597_v2  ;;  %v708_v6 = vsub.f32 %v2155_v27, %v606_v32 }
  0x44   :  { %1477 = vmatmul.mubr.f32.vlgmr.msra.gmra.mrb[0].mxu1 %v161_v29  ;;  %1729 = vmatprep.subr.bf16.mxu1 %v1728_v30  ;;  %v2231_v0 = vpack.c.bf16 %v645_v63, %v642_v62  ;;  %v764_v16 = vsub.f32 %v590_v50, %v630_v52  ;;  %v771_v17 = vsub.f32 %v591_v51, %v633_v53 }
  0x45   :  { %1731 = vmatpush3.bf16.msra.mxu1 %v1728_v30  ;;  %1483 = vmatprep.mubr.f32.mxu1 %v147_v7  ;;  %v2237_v5 = vpack.c.bf16 %v651_v4, %v648_v3  ;;  %v709_v8 = vand.u32 4294901760, %v708_v6  ;;  %v778_v21 = vsub.f32 %v592_v55, %v636_v57  ;;  %v785_v22 = vsub.f32 %v593_v56, %v639_v58 }
  0x46   :  { %1733 = vmatprep.subr.bf16.mxu1 %v1732_v31  ;;  %v765_v18 = vand.u32 4294901760, %v764_v16  ;;  %v772_v19 = vand.u32 4294901760, %v771_v17  ;;  %v792_v32 = vsub.f32 %v594_v60, %v642_v62  ;;  %v799_v50 = vsub.f32 %v595_v61, %v645_v63 }
  0x47   :  { %v710_v11 = vsub.f32 %v708_v6, %v709_v8  ;;  %v779_v26 = vand.u32 4294901760, %v778_v21  ;;  %v786_v27 = vand.u32 4294901760, %v785_v22  ;;  %v806_v58 = vsub.f32 %v596_v1, %v648_v3 }
  0x48   :  { %1505 = vmatmul.mubr.f32.vlgmr.msra.gmra.mrb[0].mxu0 %v157_v10  ;;  %v766_v20 = vsub.f32 %v764_v16, %v765_v18  ;;  %v2255_v23 = vpack.c.bf16 %v772_v19, %v765_v18  ;;  %v773_v24 = vsub.f32 %v771_v17, %v772_v19  ;;  %v793_v53 = vand.u32 4294901760, %v792_v32 }
  0x49   :  { %1747 = vmatpush3.bf16.msra.mxu0 %v1724_v9  ;;  %1511 = vmatprep.mubr.f32.mxu0 %v147_v7  ;;  %v715_v7 = vsub.f32 %v2157_v28, %v609_v33  ;;  %v2257_v29 = vpack.c.bf16 %v786_v27, %v779_v26  ;;  %v780_v30 = vsub.f32 %v778_v21, %v779_v26  ;;  %v800_v55 = vand.u32 4294901760, %v799_v50 }
  0x4a   :  { %1749 = vmatprep.subr.bf16.mxu0 %v2165_v34  ;;  %v767_v25 = vand.u32 4294901760, %v766_v20  ;;  %v774_v28 = vand.u32 4294901760, %v773_v24  ;;  %v794_v57 = vsub.f32 %v792_v32, %v793_v53  ;;  %v2273_v1 = vpack.c.bf16 %v771_v17, %v764_v16 }
  0x4b   :  { %v716_v9 = vand.u32 4294901760, %v715_v7  ;;  %v781_v51 = vand.u32 4294901760, %v780_v30  ;;  %v2277_v3 = vpack.c.bf16 %v799_v50, %v792_v32  ;;  %v2287_v30 = vsub.f32 %v2167_v35, %v612_v37 }
  0x4c   :  { %1484 = vmatmul.mubr.f32.vlgmr.msra.gmra.mrb[0].mxu1 %v157_v10  ;;  %v2259_v33 = vpack.c.bf16 %v774_v28, %v767_v25  ;;  %v2271_v25 = vpack.c.bf16 %v715_v7, %v708_v6  ;;  %v1338_v28 = vld [vmem:[%s2416_s2] ss:$0 sm:$0xff]  ;;  %v2292_v6 = vsub.f32 %v2169_v36, %v615_v38  ;;  %v2299_v32 = vsub.f32 %v2174_v39, %v618_v42 }
  0x4d   :  { %1735 = vmatpush3.bf16.msra.mxu1 %v1732_v31  ;;  %1490 = vmatprep.mubr.f32.mxu1 %v148_v13  ;;  %v717_v12 = vsub.f32 %v715_v7, %v716_v9  ;;  %v711_v13 = vand.u32 4294901760, %v710_v11  ;;  %v787_v31 = vsub.f32 %v785_v22, %v786_v27  ;;  %v801_v11 = vsub.f32 %v799_v50, %v800_v55 }
  0x4e   :  { %1845 = vmatprep.subr.bf16.mxu1 %v2165_v34  ;;  %v2304_v37 = vsub.f32 %v2176_v40, %v621_v43  ;;  %v2320_v40 = vsub.f32 %v2188_v44, %v624_v47  ;;  %v2325_v43 = vsub.f32 %v2190_v45, %v627_v48 }
  0x4f   :  { %v788_v52 = vand.u32 4294901760, %v787_v31  ;;  %v802_v18 = vand.u32 4294901760, %v801_v11  ;;  %v730_v31 = vand.u32 4294901760, %v2292_v6 }
  0x50   :  { %1512 = vmatmul.mubr.f32.vlgmr.msra.gmra.mrb[0].mxu0 %v157_v10  ;;  %v2249_v10 = vpack.c.bf16 %v716_v9, %v709_v8  ;;  %v813_v8 = vsub.f32 %v597_v2, %v651_v4  ;;  %v2263_v9 = vpack.c.bf16 %v800_v55, %v793_v53  ;;  %v2275_v2 = vpack.c.bf16 %v785_v22, %v778_v21 }
  0x51   :  { %1751 = vmatpush3.bf16.msra.mxu0 %v2165_v34  ;;  %v2261_v56 = vpack.c.bf16 %v788_v52, %v781_v51  ;;  %v723_v22 = vand.u32 4294901760, %v2287_v30  ;;  %v731_v52 = vsub.f32 %v2292_v6, %v730_v31  ;;  %v737_v53 = vand.u32 4294901760, %v2299_v32 }
  0x52   :  { %1753 = vmatprep.subr.bf16.mxu0 %v2183_v41  ;;  %v2279_v4 = vpack.c.bf16 %v813_v8, %v806_v58  ;;  %v744_v42 = vand.u32 4294901760, %v2304_v37  ;;  %v758_v45 = vand.u32 4294901760, %v2325_v43 }
  0x53   :  { %v724_v51 = vsub.f32 %v2287_v30, %v723_v22 }
  0x54   :  { %1491 = vmatmul.mubr.f32.vlgmr.msra.gmra.mrb[0].mxu1 %v158_v14  ;;  %v718_v14 = vand.u32 4294901760, %v717_v12  ;;  %v795_v12 = vand.u32 4294901760, %v794_v57  ;;  %v745_v47 = vsub.f32 %v2304_v37, %v744_v42 }
  0x55   :  { %1847 = vmatpush3.bf16.msra.mxu1 %v2165_v34  ;;  %1755 = vmatpush3.bf16.msra.mxu0 %v2183_v41  ;;  %v725_v11 = vand.u32 4294901760, %v724_v51 }
  0x56   :  { %1849 = vmatprep.subr.bf16.mxu1 %v2183_v41  ;;  %1757 = vmatprep.subr.bf16.mxu0 %v2197_v46  ;;  %v2252_v15 = vpack.c.bf16 %v718_v14, %v711_v13  ;;  %v807_v13 = vand.u32 4294901760, %v806_v58  ;;  %v814_v14 = vand.u32 4294901760, %v813_v8  ;;  %v2267_v63 = vpack.c.bf16 %v802_v18, %v795_v12 }
  0x57   :  { %v732_v12 = vand.u32 4294901760, %v731_v52 }
  0x58   :  { %v2265_v60 = vpack.c.bf16 %v814_v14, %v807_v13  ;;  %v808_v62 = vsub.f32 %v806_v58, %v807_v13  ;;  %v815_v61 = vsub.f32 %v813_v8, %v814_v14  ;;  %v1880_v58 = vpack.c.bf16 %v730_v31, %v723_v22 }
  0x59   :  { %1851 = vmatpush3.bf16.msra.mxu1 %v2183_v41  ;;  %1759 = vmatpush3.bf16.msra.mxu0 %v2197_v46  ;;  %v738_v13 = vsub.f32 %v2299_v32, %v737_v53  ;;  %v751_v14 = vand.u32 4294901760, %v2320_v40 }
  0x5a   :  { %1853 = vmatprep.subr.bf16.mxu1 %v2197_v46  ;;  %1761 = vmatprep.subr.bf16.mxu0 %v2209_v49  ;;  %v809_v19 = vand.u32 4294901760, %v808_v62  ;;  %v816_v20 = vand.u32 4294901760, %v815_v61  ;;  %v1784_v62 = vpack.c.bf16 %v732_v12, %v725_v11 }
  0x5b   :  { %v739_v61 = vand.u32 4294901760, %v738_v13 }
  0x5c   :  { %v2269_v24 = vpack.c.bf16 %v816_v20, %v809_v19  ;;  %v746_v20 = vand.u32 4294901760, %v745_v47 }
  0x5d   :  { %1855 = vmatpush3.bf16.msra.mxu1 %v2197_v46  ;;  %1763 = vmatpush3.bf16.msra.mxu0 %v2209_v49 }
  0x5e   :  { %1857 = vmatprep.subr.bf16.mxu1 %v2209_v49  ;;  %1765 = vmatprep.subr.bf16.mxu0 %v2219_v54 }
  0x61   :  { %1859 = vmatpush3.bf16.msra.mxu1 %v2209_v49  ;;  %1767 = vmatpush3.bf16.msra.mxu0 %v2219_v54 }
  0x62   :  { %1861 = vmatprep.subr.bf16.mxu1 %v2219_v54  ;;  %1769 = vmatprep.subr.bf16.mxu0 %v2225_v59 }
  0x65   :  { %1863 = vmatpush3.bf16.msra.mxu1 %v2219_v54  ;;  %1771 = vmatpush3.bf16.msra.mxu0 %v2225_v59 }
  0x66   :  { %1865 = vmatprep.subr.bf16.mxu1 %v2225_v59  ;;  %1773 = vmatprep.subr.bf16.mxu0 %v2231_v0 }
  0x69   :  { %1867 = vmatpush3.bf16.msra.mxu1 %v2225_v59  ;;  %1775 = vmatpush3.bf16.msra.mxu0 %v2231_v0 }
  0x6a   :  { %1869 = vmatprep.subr.bf16.mxu1 %v2231_v0  ;;  %1777 = vmatprep.subr.bf16.mxu0 %v2237_v5 }
  0x6d   :  { %1871 = vmatpush3.bf16.msra.mxu1 %v2231_v0  ;;  %1779 = vmatpush3.bf16.msra.mxu0 %v2237_v5 }
  0x6e   :  { %1873 = vmatprep.subr.bf16.mxu1 %v2237_v5  ;;  %1781 = vmatprep.subr.bf16.mxu0 %v2252_v15 }
  0x71   :  { %1875 = vmatpush3.bf16.msra.mxu1 %v2237_v5 }
  0x72   :  { %1877 = vmatprep.subr.bf16.mxu1 %v2249_v10 }
 0x123   :  { %v1513_v26 = vpop.f32.mrb[0].mxu0 }
 0x124   :  { %v572_v27 = vpop.f32.mrb[1].mxu0 }
 0x127   :  { %v1492_v7 = vpop.f32.mrb[0].mxu1 }
 0x128   :  { %v1940_v16 = vadd.f32 %v1492_v7, %v1338_v28  ;;  %v326_v17 = vpop.f32.mrb[1].mxu1  ;;  %v1888_v7 = vpack.c.bf16 %v758_v45, %v751_v14 }
 0x129   :  { %v1942_v21 = vadd.f32 %v1338_v28, %v326_v17  ;;  %v1884_v28 = vpack.c.bf16 %v744_v42, %v737_v53 }
 0x12a   :  { %v1941_v35 = vadd.f32 %v1940_v16, %v1513_v26  ;;  %v752_v26 = vsub.f32 %v2320_v40, %v751_v14 }
 0x12b   :  { %v1943_v36 = vadd.f32 %v1942_v21, %v572_v27  ;;  %v759_v27 = vsub.f32 %v2325_v43, %v758_v45 }
 0x12c   :  { %v2306_v38 = vand.u32 4294901760, %v1941_v35  ;;  %v753_v16 = vand.u32 4294901760, %v752_v26 }
 0x12d   :  { %v2308_v50 = vand.u32 4294901760, %v1943_v36  ;;  %v760_v17 = vand.u32 4294901760, %v759_v27 }
 0x12e   :  { %v2314_v39 = vsub.f32 %v1941_v35, %v2306_v38 }
 0x12f   :  { %v2328_v55 = vsub.f32 %v1943_v36, %v2308_v50  ;;  %v1792_v21 = vpack.c.bf16 %v760_v17, %v753_v16 }
 0x130   :  { %v698_v57 = vand.u32 4294901760, %v2314_v39 }
 0x131   :  { %v688_v8 = vand.u32 4294901760, %v2328_v55 }
 0x132   :  { %v699_v44 = vsub.f32 %v2314_v39, %v698_v57 }
 0x133   :  { %1651 = vmatprep.mubr.f32.mxu1 %v688_v8  ;;  %v689_v48 = vsub.f32 %v2328_v55, %v688_v8 }
 0x134   :  { %1652 = vmatmul.mubr.f32.vlgmr.msra.gmra.mrb[2].mxu1 %v698_v57  ;;  %v700_v19 = vand.u32 4294901760, %v699_v44 }
 0x135   :  { %1879 = vmatpush3.bf16.msra.mxu1 %v2249_v10  ;;  %1686 = vmatprep.mubr.f32.mxu1 %v2308_v50  ;;  %v690_v18 = vand.u32 4294901760, %v689_v48  ;;  %v1788_v10 = vpack.c.bf16 %v746_v20, %v739_v61 }
 0x136   :  { %1881 = vmatprep.subr.bf16.mxu1 %v1880_v58 }
 0x137   :  { %1546 = vmatprep.mubr.f32.mxu0 %v690_v18 }
 0x138   :  { %1547 = vmatmul.mubr.f32.vlgmr.msra.gmra.mrb[2].mxu0 %v700_v19 }
 0x139   :  { %1783 = vmatpush3.bf16.msra.mxu0 %v2252_v15  ;;  %1883 = vmatpush3.bf16.msra.mxu1 %v1880_v58  ;;  %v1816_v15 = vpack.c.bf16 %v2292_v6, %v2287_v30 }
 0x13a   :  { %1581 = vmatprep.mubr.f32.mxu0 %v2308_v50  ;;  %1785 = vmatprep.subr.bf16.mxu0 %v1784_v62 }
 0x13b   :  { %1885 = vmatprep.subr.bf16.mxu1 %v1884_v28 }
 0x13d   :  { %1787 = vmatpush3.bf16.msra.mxu0 %v1784_v62  ;;  %1887 = vmatpush3.bf16.msra.mxu1 %v1884_v28 }
 0x13e   :  { %1789 = vmatprep.subr.bf16.mxu0 %v1788_v10  ;;  %1889 = vmatprep.subr.bf16.mxu1 %v1888_v7 }
 0x141   :  { %1791 = vmatpush3.bf16.msra.mxu0 %v1788_v10  ;;  %1891 = vmatpush3.bf16.msra.mxu1 %v1888_v7 }
 0x142   :  { %1793 = vmatprep.subr.bf16.mxu0 %v1792_v21  ;;  %1893 = vmatprep.subr.bf16.mxu1 %v2255_v23 }
 0x145   :  { %1795 = vmatpush3.bf16.msra.mxu0 %v1792_v21  ;;  %1895 = vmatpush3.bf16.msra.mxu1 %v2255_v23  ;;  %v1824_v23 = vpack.c.bf16 %v2325_v43, %v2320_v40 }
 0x146   :  { %1797 = vmatprep.subr.bf16.mxu0 %v2259_v33  ;;  %1897 = vmatprep.subr.bf16.mxu1 %v2257_v29 }
 0x149   :  { %1799 = vmatpush3.bf16.msra.mxu0 %v2259_v33  ;;  %1899 = vmatpush3.bf16.msra.mxu1 %v2257_v29 }
 0x14a   :  { %1801 = vmatprep.subr.bf16.mxu0 %v2261_v56  ;;  %1901 = vmatprep.subr.bf16.mxu1 %v2263_v9 }
 0x14d   :  { %1803 = vmatpush3.bf16.msra.mxu0 %v2261_v56  ;;  %1903 = vmatpush3.bf16.msra.mxu1 %v2263_v9 }
 0x14e   :  { %1805 = vmatprep.subr.bf16.mxu0 %v2267_v63  ;;  %1905 = vmatprep.subr.bf16.mxu1 %v2265_v60 }
 0x151   :  { %1807 = vmatpush3.bf16.msra.mxu0 %v2267_v63  ;;  %1907 = vmatpush3.bf16.msra.mxu1 %v2265_v60 }
 0x152   :  { %1809 = vmatprep.subr.bf16.mxu0 %v2269_v24  ;;  %1909 = vmatprep.subr.bf16.mxu1 %v2165_v34 }
 0x154   :  { %1687 = vmatmul.mubr.f32.vlgmr.msra.gmra.mrb[2].mxu1 %v2306_v38 }
 0x155   :  { %1811 = vmatpush3.bf16.msra.mxu0 %v2269_v24  ;;  %1911 = vmatpush3.bf16.msra.mxu1 %v2165_v34  ;;  %v1820_v34 = vpack.c.bf16 %v2304_v37, %v2299_v32 }
 0x156   :  { %1721 = vmatprep.mubr.f32.mxu1 %v2308_v50  ;;  %1813 = vmatprep.subr.bf16.mxu0 %v2271_v25 }
 0x157   :  { %1913 = vmatprep.subr.bf16.mxu1 %v2183_v41 }
 0x158   :  { %1582 = vmatmul.mubr.f32.vlgmr.msra.gmra.mrb[2].mxu0 %v2306_v38 }
 0x159   :  { %1815 = vmatpush3.bf16.msra.mxu0 %v2271_v25  ;;  %1616 = vmatprep.mubr.f32.mxu0 %v2328_v55 }
 0x15a   :  { %1915 = vmatpush3.bf16.msra.mxu1 %v2183_v41  ;;  %1817 = vmatprep.subr.bf16.mxu0 %v1816_v15 }
 0x15b   :  { %1917 = vmatprep.subr.bf16.mxu1 %v2197_v46 }
 0x15d   :  { %1819 = vmatpush3.bf16.msra.mxu0 %v1816_v15 }
 0x15e   :  { %1919 = vmatpush3.bf16.msra.mxu1 %v2197_v46  ;;  %1821 = vmatprep.subr.bf16.mxu0 %v1820_v34 }
 0x15f   :  { %1921 = vmatprep.subr.bf16.mxu1 %v2209_v49 }
 0x161   :  { %1823 = vmatpush3.bf16.msra.mxu0 %v1820_v34 }
 0x162   :  { %1923 = vmatpush3.bf16.msra.mxu1 %v2209_v49  ;;  %1825 = vmatprep.subr.bf16.mxu0 %v1824_v23  ;;  %v1339_v49 = vld [vmem:[%s2418_s4] ss:$0 sm:$0xff] }
 0x163   :  { %1925 = vmatprep.subr.bf16.mxu1 %v2219_v54 }
 0x165   :  { %1827 = vmatpush3.bf16.msra.mxu0 %v1824_v23 }
 0x166   :  { %1927 = vmatpush3.bf16.msra.mxu1 %v2219_v54  ;;  %1829 = vmatprep.subr.bf16.mxu0 %v2273_v1 }
 0x167   :  { %1929 = vmatprep.subr.bf16.mxu1 %v2225_v59 }
 0x169   :  { %1831 = vmatpush3.bf16.msra.mxu0 %v2273_v1 }
 0x16a   :  { %1931 = vmatpush3.bf16.msra.mxu1 %v2225_v59  ;;  %1833 = vmatprep.subr.bf16.mxu0 %v2275_v2 }
 0x16b   :  { %1933 = vmatprep.subr.bf16.mxu1 %v2231_v0 }
 0x16d   :  { %1835 = vmatpush3.bf16.msra.mxu0 %v2275_v2 }
 0x16e   :  { %1935 = vmatpush3.bf16.msra.mxu1 %v2231_v0  ;;  %1837 = vmatprep.subr.bf16.mxu0 %v2277_v3 }
 0x16f   :  { %1937 = vmatprep.subr.bf16.mxu1 %v2237_v5 }
 0x171   :  { %1839 = vmatpush3.bf16.msra.mxu0 %v2277_v3 }
 0x172   :  { %1939 = vmatpush3.bf16.msra.mxu1 %v2237_v5  ;;  %1841 = vmatprep.subr.bf16.mxu0 %v2279_v4 }
 0x175   :  { %1722 = vmatmul.mubr.f32.vlgmr.msra.gmra.mrb[2].mxu1 %v2306_v38  ;;  %1843 = vmatpush3.bf16.msra.mxu0 %v2279_v4 }
 0x178   :  { %1617 = vmatmul.mubr.f32.vlgmr.msra.gmra.mrb[2].mxu0 %v2314_v39 }
 0x248   :  { %v1723_v41 = vpop.f32.mrb[2].mxu1 }
 0x249   :  { %v1279_v46 = vpop.f32.mrb[3].mxu1 }
 0x24b   :  { %v1618_v54 = vpop.f32.mrb[2].mxu0 }
 0x24c   :  { %v1944_v59 = vadd.f32 %v1618_v54, %v1339_v49  ;;  %v963_v0 = vpop.f32.mrb[3].mxu0 }
 0x24d   :  { %v1946_v29 = vadd.f32 %v1339_v49, %v963_v0 }
 0x24e   :  { %v1945_v33 = vadd.f32 %v1944_v59, %v1723_v41 }
 0x24f   :  { %v1947_v5 = vadd.f32 %v1946_v29, %v1279_v46 }
 0x251   :  { %1289 = vxpose.xlu0.b32.start [1/2] (short) (narrow) %v1947_v5, 8 }
 0x255   :  { %1290 = vxpose.xlu0.b32.end [2/2] (short) (narrow) %v1945_v33, 8 }
 0x2d1   :  { %v1305_v56 = vpop.trf.xlu0 }
 0x2d2   :  { %1321 = vst.msk [vmem:[#allocation8] sm:$0xff] %vm73_vm0, %v1305_v56 }
 0x2d3   :  { %2048 = shalt.err (!%p2045_p0)
}
 0x2d4   :  { %s2049_s10 = scalar_lea.hbm %s2419_s5, 128 }
 0x2d5   :  { %p2050_p1 = scmp.ne.s32.totalorder %s2419_s5, %s2049_s10  ;;  %p2053_p2 = scmp.lt.u32.totalorder %s2049_s10, %s2419_s5 }
 0x2d7   :  { %p2055_p3 = pnand %p2053_p2, %p2050_p1 }
 0x2d9   :  { %2058 = shalt.err (!%p2055_p3)
}
 0x2da   :  { %1331 = dma.vmem_to_hbm [thread:$0]  %s1329_s7, 128, %s2419_s5, [#allocation4]  }
 0x2db   :  { %2063 = dma.done.wait [#allocation4], 128  }
 0x2dc   :  { %2064 = vsyncadd [#allocation4], 4294967168 }
 0x2dd   :  { %1335 = vsyncpa [#allocation3], 1 }
 0x2de   :  { %1336 = vsyncpa [#allocation6], 1 }
 0x2df   :  { %1337 = vsyncpa [#allocation4], 1 }

// kernel: tpu_custom_call.1
= control target key start
LH: loop header
LB: loop body
LE: loop exit
PB: predicated region body
PF: predicated region fallthrough
CT: control target
= control target key end

     0   :  { %10 = vsyncpa [#allocation3], 0  ;;  %s2414_s0 = inlined_call_operand.hbm [shape: f32[16,16], index: 0, kind: input, shape index: {}]   ;;  %s2415_s1 = inlined_call_operand.hbm [shape: f32[16,128], index: 1, kind: input, shape index: {}]   ;;  %s2416_s2 = inlined_call_operand.vmem [shape: f32[1,128], index: 2, kind: input, shape index: {}]   ;;  %s2417_s3 = inlined_call_operand.hbm [shape: f32[128,128], index: 3, kind: input, shape index: {}]   ;;  %s2418_s4 = inlined_call_operand.vmem [shape: f32[1,128], index: 4, kind: input, shape index: {}]   ;;  %s2419_s5 = inlined_call_operand.hbm [shape: f32[8,16], index: 5, kind: output, shape index: {}]  }
   0x1   :  { %11 = vsyncpa [#allocation6], 0 }
   0x2   :  { %12 = vsyncpa [#allocation4], 0  ;;  %s2065_s18 = smov [#allocation5]   ;;  %s2066_s20 = smov [#allocation2]  }
   0x3   :  { %s30_s19 = sshll.u32 %s2065_s18, 4  ;;  %s18_s21 = sshll.u32 %s2066_s20, 4  ;;  %s31_s19 = int_to_ptr.vmem [resolvable:$true] %s30_s19  ;;  %s2101_s21 = int_to_ptr.vmem [resolvable:$true] %s18_s21 }
   0x4   :  { %s1971_s24 = scalar_lea.hbm %s2415_s1, 256 }
   0x5   :  { %p1972_p0 = scmp.ne.s32.totalorder %s2415_s1, %s1971_s24  ;;  %p1975_p1 = scmp.lt.u32.totalorder %s1971_s24, %s2415_s1 }
   0x7   :  { %p1977_p2 = pnand %p1975_p1, %p1972_p0 }
   0x9   :  { %1980 = shalt.err (!%p1977_p2)
}
   0xa   :  { %s1981_s29 = scalar_lea.vmem %s31_s19, 256  ;;  %p1986_p4 = scmp.lt.s32.totalorder %s31_s19, %s31_s19 }
   0xb   :  { %p1982_p3 = scmp.ne.s32.totalorder %s31_s19, %s1981_s29  ;;  %p1987_p5 = scmp.lt.s32.totalorder %s1981_s29, %s1981_s29 }
   0xd   :  { %p1988_p6 = por %p1987_p5, %p1986_p4 }
   0xf   :  { %p1989_p7 = pnand %p1988_p6, %p1982_p3 }
  0x11   :  { %1992 = shalt.err (!%p1989_p7)
}
  0x12   :  { %s2067_s30 = smov 128   ;;  %s2068_s6 = smov 8  }
  0x13   :  { %36 = dma.hbm_to_vmem [thread:$0]  %s2415_s1, 256, %s31_s19, [#allocation6], %s2067_s30, %s2067_s30, %s2068_s6  }
  0x14   :  { %s1993_s11 = scalar_lea.hbm %s2414_s0, 256 }
  0x15   :  { %p1994_p8 = scmp.ne.s32.totalorder %s2414_s0, %s1993_s11  ;;  %p1997_p9 = scmp.lt.u32.totalorder %s1993_s11, %s2414_s0 }
  0x17   :  { %p1999_p10 = pnand %p1997_p9, %p1994_p8 }
  0x19   :  { %2002 = shalt.err (!%p1999_p10)
}
  0x1a   :  { %s2003_s16 = scalar_lea.vmem %s2101_s21, 256  ;;  %p2008_p12 = scmp.lt.s32.totalorder %s2101_s21, %s2101_s21 }
  0x1b   :  { %p2004_p11 = scmp.ne.s32.totalorder %s2101_s21, %s2003_s16  ;;  %p2009_p13 = scmp.lt.s32.totalorder %s2003_s16, %s2003_s16 }
  0x1d   :  { %p2010_p0 = por %p2009_p13, %p2008_p12 }
  0x1f   :  { %p2011_p1 = pnand %p2010_p0, %p2004_p11 }
  0x21   :  { %2014 = shalt.err (!%p2011_p1)
}
  0x22   :  { %24 = dma.hbm_to_vmem [thread:$0]  %s2414_s0, 256, %s2101_s21, [#allocation3], %s2067_s30, %s2067_s30, %s2068_s6  }
  0x23   :  { %s2069_s18 = smov [#allocation7]   ;;  %s2015_s23 = scalar_lea.hbm %s2417_s3, 2048 }
  0x24   :  { %s44_s19 = sshll.u32 %s2069_s18, 4  ;;  %p2016_p2 = scmp.ne.s32.totalorder %s2417_s3, %s2015_s23  ;;  %s45_s19 = int_to_ptr.vmem [resolvable:$true] %s44_s19 }
  0x25   :  { %p2019_p3 = scmp.lt.u32.totalorder %s2015_s23, %s2417_s3 }
  0x27   :  { %p2021_p4 = pnand %p2019_p3, %p2016_p2 }
  0x29   :  { %2024 = shalt.err (!%p2021_p4)
}
  0x2a   :  { %s2025_s28 = scalar_lea.vmem %s45_s19, 2048  ;;  %p2030_p6 = scmp.lt.s32.totalorder %s45_s19, %s45_s19 }
  0x2b   :  { %p2026_p5 = scmp.ne.s32.totalorder %s45_s19, %s2025_s28  ;;  %p2031_p7 = scmp.lt.s32.totalorder %s2025_s28, %s2025_s28 }
  0x2d   :  { %p2032_p8 = por %p2031_p7, %p2030_p6 }
  0x2f   :  { %p2033_p9 = pnand %p2032_p8, %p2026_p5 }
  0x31   :  { %2036 = shalt.err (!%p2033_p9)
}
  0x32   :  { %50 = dma.hbm_to_vmem [thread:$0]  %s2417_s3, 2048, %s45_s19, [#allocation6], %s2067_s30, %s2067_s30, %s2068_s6  }
  0x33   :  { %2059 = dma.done.wait [#allocation3], 256  }
  0x34   :  { %2060 = vsyncadd [#allocation3], 4294967040 }
  0x35   :  { %2061 = dma.done.wait [#allocation6], 2304  }
  0x36   :  { %2062 = vsyncadd [#allocation6], 4294964992  ;;  %vm73_vm0 = vcmask 130048   ;;  %v64_v0 = vld [vmem:[#allocation5] sm:$0xff]  ;;  %v65_v1 = vld [vmem:[#allocation5 + $0x8] sm:$0xff]  ;;  %s2070_s6 = smov [#allocation8]  }
  0x37   :  { %v62_v2 = vld [vmem:[#allocation2] sm:$0xff]  ;;  %v81_v3 = vand.u32 4294901760, %v64_v0  ;;  %v84_v4 = vand.u32 4294901760, %v65_v1  ;;  %v63_v6 = vld [vmem:[#allocation2 + $0x8] sm:$0xff]  ;;  %v2167_v35 = vld [vmem:[#allocation7 + $0x10] sm:$0xff]  ;;  %s1328_s7 = sshll.u32 %s2070_s6, 4  ;;  %s1329_s7 = int_to_ptr.vmem [resolvable:$true] %s1328_s7 }
  0x38   :  { %v75_v5 = vsel %vm73_vm0, %v62_v2, 0  ;;  %v78_v8 = vsel %vm73_vm0, %v63_v6, 0  ;;  %v2155_v27 = vld [vmem:[#allocation7] sm:$0xff]  ;;  %v2157_v28 = vld [vmem:[#allocation7 + $0x8] sm:$0xff]  ;;  %v2169_v36 = vld [vmem:[#allocation7 + $0x18] sm:$0xff]  ;;  %v612_v37 = vand.u32 4294901760, %v2167_v35  ;;  %p2042_p11 = scmp.lt.s32.totalorder %s1329_s7, %s1329_s7 }
  0x39   :  { %v147_v7 = vand.u32 4294901760, %v75_v5  ;;  %v1724_v9 = vpack.c.bf16 %v84_v4, %v81_v3  ;;  %v157_v10 = vand.u32 4294901760, %v78_v8  ;;  %v169_v11 = vsub.f32 %v64_v0, %v81_v3  ;;  %v2174_v39 = vld [vmem:[#allocation7 + $0x20] sm:$0xff]  ;;  %v2176_v40 = vld [vmem:[#allocation7 + $0x28] sm:$0xff]  ;;  %v2188_v44 = vld [vmem:[#allocation7 + $0x30] sm:$0xff]  ;;  %s2037_s8 = scalar_lea.vmem %s1329_s7, 128 }
  0x3a   :  { %v176_v12 = vsub.f32 %v65_v1, %v84_v4  ;;  %v606_v32 = vand.u32 4294901760, %v2155_v27  ;;  %v609_v33 = vand.u32 4294901760, %v2157_v28  ;;  %v615_v38 = vand.u32 4294901760, %v2169_v36  ;;  %v2190_v45 = vld [vmem:[#allocation7 + $0x38] sm:$0xff]  ;;  %v590_v50 = vld [vmem:[#allocation7 + $0x40] sm:$0xff]  ;;  %v591_v51 = vld [vmem:[#allocation7 + $0x48] sm:$0xff]  ;;  %p2038_p10 = scmp.ne.s32.totalorder %s1329_s7, %s2037_s8  ;;  %p2043_p12 = scmp.lt.s32.totalorder %s2037_s8, %s2037_s8 }
  0x3b   :  { %v148_v13 = vsub.f32 %v75_v5, %v147_v7  ;;  %1737 = vmatprep.subr.bf16.mxu0 %v1724_v9  ;;  %1725 = vmatprep.subr.bf16.mxu1 %v1724_v9  ;;  %v158_v14 = vsub.f32 %v78_v8, %v157_v10  ;;  %v170_v15 = vand.u32 4294901760, %v169_v11  ;;  %v618_v42 = vand.u32 4294901760, %v2174_v39  ;;  %v592_v55 = vld [vmem:[#allocation7 + $0x50] sm:$0xff]  ;;  %v593_v56 = vld [vmem:[#allocation7 + $0x58] sm:$0xff]  ;;  %v594_v60 = vld [vmem:[#allocation7 + $0x60] sm:$0xff] }
  0x3c   :  { %v177_v16 = vand.u32 4294901760, %v176_v12  ;;  %1739 = vmatpush3.bf16.msra.mxu0 %v1724_v9  ;;  %1727 = vmatpush3.bf16.msra.mxu1 %v1724_v9  ;;  %v1732_v31 = vpack.c.bf16 %v176_v12, %v169_v11  ;;  %v2165_v34 = vpack.c.bf16 %v609_v33, %v606_v32  ;;  %v2183_v41 = vpack.c.bf16 %v615_v38, %v612_v37  ;;  %v595_v61 = vld [vmem:[#allocation7 + $0x68] sm:$0xff]  ;;  %v596_v1 = vld [vmem:[#allocation7 + $0x70] sm:$0xff]  ;;  %v597_v2 = vld [vmem:[#allocation7 + $0x78] sm:$0xff]  ;;  %p2044_p13 = por %p2043_p12, %p2042_p11 }
  0x3d   :  { %v149_v17 = vand.u32 4294901760, %v148_v13  ;;  %v159_v18 = vand.u32 4294901760, %v158_v14  ;;  %v171_v19 = vsub.f32 %v169_v11, %v170_v15  ;;  %v621_v43 = vand.u32 4294901760, %v2176_v40 }
  0x3e   :  { %v178_v20 = vsub.f32 %v176_v12, %v177_v16  ;;  %v1740_v21 = vpack.c.bf16 %v177_v16, %v170_v15  ;;  %v624_v47 = vand.u32 4294901760, %v2188_v44  ;;  %v627_v48 = vand.u32 4294901760, %v2190_v45  ;;  %p2045_p0 = pnand %p2044_p13, %p2038_p10 }
  0x3f   :  { %1497 = vmatprep.mubr.f32.mxu0 %v149_v17  ;;  %v150_v22 = vsub.f32 %v148_v13, %v149_v17  ;;  %v160_v23 = vsub.f32 %v158_v14, %v159_v18  ;;  %v172_v24 = vand.u32 4294901760, %v171_v19  ;;  %v2197_v46 = vpack.c.bf16 %v621_v43, %v618_v42 }
  0x40   :  { %1498 = vmatmul.mubr.f32.vlgmr.msra.gmra.mrb[0].mxu0 %v159_v18  ;;  %v179_v25 = vand.u32 4294901760, %v178_v20  ;;  %1741 = vmatprep.subr.bf16.mxu0 %v1740_v21  ;;  %v2209_v49 = vpack.c.bf16 %v627_v48, %v624_v47  ;;  %v630_v52 = vand.u32 4294901760, %v590_v50  ;;  %v633_v53 = vand.u32 4294901760, %v591_v51 }
  0x41   :  { %v151_v26 = vand.u32 4294901760, %v150_v22  ;;  %1743 = vmatpush3.bf16.msra.mxu0 %v1740_v21  ;;  %1504 = vmatprep.mubr.f32.mxu0 %v147_v7  ;;  %v161_v29 = vand.u32 4294901760, %v160_v23  ;;  %v636_v57 = vand.u32 4294901760, %v592_v55  ;;  %v639_v58 = vand.u32 4294901760, %v593_v56 }
  0x42   :  { %v1728_v30 = vpack.c.bf16 %v179_v25, %v172_v24  ;;  %1745 = vmatprep.subr.bf16.mxu0 %v1724_v9  ;;  %v2219_v54 = vpack.c.bf16 %v633_v53, %v630_v52  ;;  %v642_v62 = vand.u32 4294901760, %v594_v60  ;;  %v645_v63 = vand.u32 4294901760, %v595_v61 }
  0x43   :  { %1476 = vmatprep.mubr.f32.mxu1 %v151_v26  ;;  %v2225_v59 = vpack.c.bf16 %v639_v58, %v636_v57  ;;  %v648_v3 = vand.u32 4294901760, %v596_v1  ;;  %v651_v4 = vand.u32 4294901760, %v597_v2  ;;  %v708_v6 = vsub.f32 %v2155_v27, %v606_v32 }
  0x44   :  { %1477 = vmatmul.mubr.f32.vlgmr.msra.gmra.mrb[0].mxu1 %v161_v29  ;;  %1729 = vmatprep.subr.bf16.mxu1 %v1728_v30  ;;  %v2231_v0 = vpack.c.bf16 %v645_v63, %v642_v62  ;;  %v764_v16 = vsub.f32 %v590_v50, %v630_v52  ;;  %v771_v17 = vsub.f32 %v591_v51, %v633_v53 }
  0x45   :  { %1731 = vmatpush3.bf16.msra.mxu1 %v1728_v30  ;;  %1483 = vmatprep.mubr.f32.mxu1 %v147_v7  ;;  %v2237_v5 = vpack.c.bf16 %v651_v4, %v648_v3  ;;  %v709_v8 = vand.u32 4294901760, %v708_v6  ;;  %v778_v21 = vsub.f32 %v592_v55, %v636_v57  ;;  %v785_v22 = vsub.f32 %v593_v56, %v639_v58 }
  0x46   :  { %1733 = vmatprep.subr.bf16.mxu1 %v1732_v31  ;;  %v765_v18 = vand.u32 4294901760, %v764_v16  ;;  %v772_v19 = vand.u32 4294901760, %v771_v17  ;;  %v792_v32 = vsub.f32 %v594_v60, %v642_v62  ;;  %v799_v50 = vsub.f32 %v595_v61, %v645_v63 }
  0x47   :  { %v710_v11 = vsub.f32 %v708_v6, %v709_v8  ;;  %v779_v26 = vand.u32 4294901760, %v778_v21  ;;  %v786_v27 = vand.u32 4294901760, %v785_v22  ;;  %v806_v58 = vsub.f32 %v596_v1, %v648_v3 }
  0x48   :  { %1505 = vmatmul.mubr.f32.vlgmr.msra.gmra.mrb[0].mxu0 %v157_v10  ;;  %v766_v20 = vsub.f32 %v764_v16, %v765_v18  ;;  %v2255_v23 = vpack.c.bf16 %v772_v19, %v765_v18  ;;  %v773_v24 = vsub.f32 %v771_v17, %v772_v19  ;;  %v793_v53 = vand.u32 4294901760, %v792_v32 }
  0x49   :  { %1747 = vmatpush3.bf16.msra.mxu0 %v1724_v9  ;;  %1511 = vmatprep.mubr.f32.mxu0 %v147_v7  ;;  %v715_v7 = vsub.f32 %v2157_v28, %v609_v33  ;;  %v2257_v29 = vpack.c.bf16 %v786_v27, %v779_v26  ;;  %v780_v30 = vsub.f32 %v778_v21, %v779_v26  ;;  %v800_v55 = vand.u32 4294901760, %v799_v50 }
  0x4a   :  { %1749 = vmatprep.subr.bf16.mxu0 %v2165_v34  ;;  %v767_v25 = vand.u32 4294901760, %v766_v20  ;;  %v774_v28 = vand.u32 4294901760, %v773_v24  ;;  %v794_v57 = vsub.f32 %v792_v32, %v793_v53  ;;  %v2273_v1 = vpack.c.bf16 %v771_v17, %v764_v16 }
  0x4b   :  { %v716_v9 = vand.u32 4294901760, %v715_v7  ;;  %v781_v51 = vand.u32 4294901760, %v780_v30  ;;  %v2277_v3 = vpack.c.bf16 %v799_v50, %v792_v32  ;;  %v2287_v30 = vsub.f32 %v2167_v35, %v612_v37 }
  0x4c   :  { %1484 = vmatmul.mubr.f32.vlgmr.msra.gmra.mrb[0].mxu1 %v157_v10  ;;  %v2259_v33 = vpack.c.bf16 %v774_v28, %v767_v25  ;;  %v2271_v25 = vpack.c.bf16 %v715_v7, %v708_v6  ;;  %v1338_v28 = vld [vmem:[%s2416_s2] ss:$0 sm:$0xff]  ;;  %v2292_v6 = vsub.f32 %v2169_v36, %v615_v38  ;;  %v2299_v32 = vsub.f32 %v2174_v39, %v618_v42 }
  0x4d   :  { %1735 = vmatpush3.bf16.msra.mxu1 %v1732_v31  ;;  %1490 = vmatprep.mubr.f32.mxu1 %v148_v13  ;;  %v717_v12 = vsub.f32 %v715_v7, %v716_v9  ;;  %v711_v13 = vand.u32 4294901760, %v710_v11  ;;  %v787_v31 = vsub.f32 %v785_v22, %v786_v27  ;;  %v801_v11 = vsub.f32 %v799_v50, %v800_v55 }
  0x4e   :  { %1845 = vmatprep.subr.bf16.mxu1 %v2165_v34  ;;  %v2304_v37 = vsub.f32 %v2176_v40, %v621_v43  ;;  %v2320_v40 = vsub.f32 %v2188_v44, %v624_v47  ;;  %v2325_v43 = vsub.f32 %v2190_v45, %v627_v48 }
  0x4f   :  { %v788_v52 = vand.u32 4294901760, %v787_v31  ;;  %v802_v18 = vand.u32 4294901760, %v801_v11  ;;  %v730_v31 = vand.u32 4294901760, %v2292_v6 }
  0x50   :  { %1512 = vmatmul.mubr.f32.vlgmr.msra.gmra.mrb[0].mxu0 %v157_v10  ;;  %v2249_v10 = vpack.c.bf16 %v716_v9, %v709_v8  ;;  %v813_v8 = vsub.f32 %v597_v2, %v651_v4  ;;  %v2263_v9 = vpack.c.bf16 %v800_v55, %v793_v53  ;;  %v2275_v2 = vpack.c.bf16 %v785_v22, %v778_v21 }
  0x51   :  { %1751 = vmatpush3.bf16.msra.mxu0 %v2165_v34  ;;  %v2261_v56 = vpack.c.bf16 %v788_v52, %v781_v51  ;;  %v723_v22 = vand.u32 4294901760, %v2287_v30  ;;  %v731_v52 = vsub.f32 %v2292_v6, %v730_v31  ;;  %v737_v53 = vand.u32 4294901760, %v2299_v32 }
  0x52   :  { %1753 = vmatprep.subr.bf16.mxu0 %v2183_v41  ;;  %v2279_v4 = vpack.c.bf16 %v813_v8, %v806_v58  ;;  %v744_v42 = vand.u32 4294901760, %v2304_v37  ;;  %v758_v45 = vand.u32 4294901760, %v2325_v43 }
  0x53   :  { %v724_v51 = vsub.f32 %v2287_v30, %v723_v22 }
  0x54   :  { %1491 = vmatmul.mubr.f32.vlgmr.msra.gmra.mrb[0].mxu1 %v158_v14  ;;  %v718_v14 = vand.u32 4294901760, %v717_v12  ;;  %v795_v12 = vand.u32 4294901760, %v794_v57  ;;  %v745_v47 = vsub.f32 %v2304_v37, %v744_v42 }
  0x55   :  { %1847 = vmatpush3.bf16.msra.mxu1 %v2165_v34  ;;  %1755 = vmatpush3.bf16.msra.mxu0 %v2183_v41  ;;  %v725_v11 = vand.u32 4294901760, %v724_v51 }
  0x56   :  { %1849 = vmatprep.subr.bf16.mxu1 %v2183_v41  ;;  %1757 = vmatprep.subr.bf16.mxu0 %v2197_v46  ;;  %v2252_v15 = vpack.c.bf16 %v718_v14, %v711_v13  ;;  %v807_v13 = vand.u32 4294901760, %v806_v58  ;;  %v814_v14 = vand.u32 4294901760, %v813_v8  ;;  %v2267_v63 = vpack.c.bf16 %v802_v18, %v795_v12 }
  0x57   :  { %v732_v12 = vand.u32 4294901760, %v731_v52 }
  0x58   :  { %v2265_v60 = vpack.c.bf16 %v814_v14, %v807_v13  ;;  %v808_v62 = vsub.f32 %v806_v58, %v807_v13  ;;  %v815_v61 = vsub.f32 %v813_v8, %v814_v14  ;;  %v1880_v58 = vpack.c.bf16 %v730_v31, %v723_v22 }
  0x59   :  { %1851 = vmatpush3.bf16.msra.mxu1 %v2183_v41  ;;  %1759 = vmatpush3.bf16.msra.mxu0 %v2197_v46  ;;  %v738_v13 = vsub.f32 %v2299_v32, %v737_v53  ;;  %v751_v14 = vand.u32 4294901760, %v2320_v40 }
  0x5a   :  { %1853 = vmatprep.subr.bf16.mxu1 %v2197_v46  ;;  %1761 = vmatprep.subr.bf16.mxu0 %v2209_v49  ;;  %v809_v19 = vand.u32 4294901760, %v808_v62  ;;  %v816_v20 = vand.u32 4294901760, %v815_v61  ;;  %v1784_v62 = vpack.c.bf16 %v732_v12, %v725_v11 }
  0x5b   :  { %v739_v61 = vand.u32 4294901760, %v738_v13 }
  0x5c   :  { %v2269_v24 = vpack.c.bf16 %v816_v20, %v809_v19  ;;  %v746_v20 = vand.u32 4294901760, %v745_v47 }
  0x5d   :  { %1855 = vmatpush3.bf16.msra.mxu1 %v2197_v46  ;;  %1763 = vmatpush3.bf16.msra.mxu0 %v2209_v49 }
  0x5e   :  { %1857 = vmatprep.subr.bf16.mxu1 %v2209_v49  ;;  %1765 = vmatprep.subr.bf16.mxu0 %v2219_v54 }
  0x61   :  { %1859 = vmatpush3.bf16.msra.mxu1 %v2209_v49  ;;  %1767 = vmatpush3.bf16.msra.mxu0 %v2219_v54 }
  0x62   :  { %1861 = vmatprep.subr.bf16.mxu1 %v2219_v54  ;;  %1769 = vmatprep.subr.bf16.mxu0 %v2225_v59 }
  0x65   :  { %1863 = vmatpush3.bf16.msra.mxu1 %v2219_v54  ;;  %1771 = vmatpush3.bf16.msra.mxu0 %v2225_v59 }
  0x66   :  { %1865 = vmatprep.subr.bf16.mxu1 %v2225_v59  ;;  %1773 = vmatprep.subr.bf16.mxu0 %v2231_v0 }
  0x69   :  { %1867 = vmatpush3.bf16.msra.mxu1 %v2225_v59  ;;  %1775 = vmatpush3.bf16.msra.mxu0 %v2231_v0 }
  0x6a   :  { %1869 = vmatprep.subr.bf16.mxu1 %v2231_v0  ;;  %1777 = vmatprep.subr.bf16.mxu0 %v2237_v5 }
  0x6d   :  { %1871 = vmatpush3.bf16.msra.mxu1 %v2231_v0  ;;  %1779 = vmatpush3.bf16.msra.mxu0 %v2237_v5 }
  0x6e   :  { %1873 = vmatprep.subr.bf16.mxu1 %v2237_v5  ;;  %1781 = vmatprep.subr.bf16.mxu0 %v2252_v15 }
  0x71   :  { %1875 = vmatpush3.bf16.msra.mxu1 %v2237_v5 }
  0x72   :  { %1877 = vmatprep.subr.bf16.mxu1 %v2249_v10 }
 0x123   :  { %v1513_v26 = vpop.f32.mrb[0].mxu0 }
 0x124   :  { %v572_v27 = vpop.f32.mrb[1].mxu0 }
 0x127   :  { %v1492_v7 = vpop.f32.mrb[0].mxu1 }
 0x128   :  { %v1940_v16 = vadd.f32 %v1492_v7, %v1338_v28  ;;  %v326_v17 = vpop.f32.mrb[1].mxu1  ;;  %v1888_v7 = vpack.c.bf16 %v758_v45, %v751_v14 }
 0x129   :  { %v1942_v21 = vadd.f32 %v1338_v28, %v326_v17  ;;  %v1884_v28 = vpack.c.bf16 %v744_v42, %v737_v53 }
 0x12a   :  { %v1941_v35 = vadd.f32 %v1940_v16, %v1513_v26  ;;  %v752_v26 = vsub.f32 %v2320_v40, %v751_v14 }
 0x12b   :  { %v1943_v36 = vadd.f32 %v1942_v21, %v572_v27  ;;  %v759_v27 = vsub.f32 %v2325_v43, %v758_v45 }
 0x12c   :  { %v2306_v38 = vand.u32 4294901760, %v1941_v35  ;;  %v753_v16 = vand.u32 4294901760, %v752_v26 }
 0x12d   :  { %v2308_v50 = vand.u32 4294901760, %v1943_v36  ;;  %v760_v17 = vand.u32 4294901760, %v759_v27 }
 0x12e   :  { %v2314_v39 = vsub.f32 %v1941_v35, %v2306_v38 }
 0x12f   :  { %v2328_v55 = vsub.f32 %v1943_v36, %v2308_v50  ;;  %v1792_v21 = vpack.c.bf16 %v760_v17, %v753_v16 }
 0x130   :  { %v698_v57 = vand.u32 4294901760, %v2314_v39 }
 0x131   :  { %v688_v8 = vand.u32 4294901760, %v2328_v55 }
 0x132   :  { %v699_v44 = vsub.f32 %v2314_v39, %v698_v57 }
 0x133   :  { %1651 = vmatprep.mubr.f32.mxu1 %v688_v8  ;;  %v689_v48 = vsub.f32 %v2328_v55, %v688_v8 }
 0x134   :  { %1652 = vmatmul.mubr.f32.vlgmr.msra.gmra.mrb[2].mxu1 %v698_v57  ;;  %v700_v19 = vand.u32 4294901760, %v699_v44 }
 0x135   :  { %1879 = vmatpush3.bf16.msra.mxu1 %v2249_v10  ;;  %1686 = vmatprep.mubr.f32.mxu1 %v2308_v50  ;;  %v690_v18 = vand.u32 4294901760, %v689_v48  ;;  %v1788_v10 = vpack.c.bf16 %v746_v20, %v739_v61 }
 0x136   :  { %1881 = vmatprep.subr.bf16.mxu1 %v1880_v58 }
 0x137   :  { %1546 = vmatprep.mubr.f32.mxu0 %v690_v18 }
 0x138   :  { %1547 = vmatmul.mubr.f32.vlgmr.msra.gmra.mrb[2].mxu0 %v700_v19 }
 0x139   :  { %1783 = vmatpush3.bf16.msra.mxu0 %v2252_v15  ;;  %1883 = vmatpush3.bf16.msra.mxu1 %v1880_v58  ;;  %v1816_v15 = vpack.c.bf16 %v2292_v6, %v2287_v30 }
 0x13a   :  { %1581 = vmatprep.mubr.f32.mxu0 %v2308_v50  ;;  %1785 = vmatprep.subr.bf16.mxu0 %v1784_v62 }
 0x13b   :  { %1885 = vmatprep.subr.bf16.mxu1 %v1884_v28 }
 0x13d   :  { %1787 = vmatpush3.bf16.msra.mxu0 %v1784_v62  ;;  %1887 = vmatpush3.bf16.msra.mxu1 %v1884_v28 }
 0x13e   :  { %1789 = vmatprep.subr.bf16.mxu0 %v1788_v10  ;;  %1889 = vmatprep.subr.bf16.mxu1 %v1888_v7 }
 0x141   :  { %1791 = vmatpush3.bf16.msra.mxu0 %v1788_v10  ;;  %1891 = vmatpush3.bf16.msra.mxu1 %v1888_v7 }
 0x142   :  { %1793 = vmatprep.subr.bf16.mxu0 %v1792_v21  ;;  %1893 = vmatprep.subr.bf16.mxu1 %v2255_v23 }
 0x145   :  { %1795 = vmatpush3.bf16.msra.mxu0 %v1792_v21  ;;  %1895 = vmatpush3.bf16.msra.mxu1 %v2255_v23  ;;  %v1824_v23 = vpack.c.bf16 %v2325_v43, %v2320_v40 }
 0x146   :  { %1797 = vmatprep.subr.bf16.mxu0 %v2259_v33  ;;  %1897 = vmatprep.subr.bf16.mxu1 %v2257_v29 }
 0x149   :  { %1799 = vmatpush3.bf16.msra.mxu0 %v2259_v33  ;;  %1899 = vmatpush3.bf16.msra.mxu1 %v2257_v29 }
 0x14a   :  { %1801 = vmatprep.subr.bf16.mxu0 %v2261_v56  ;;  %1901 = vmatprep.subr.bf16.mxu1 %v2263_v9 }
 0x14d   :  { %1803 = vmatpush3.bf16.msra.mxu0 %v2261_v56  ;;  %1903 = vmatpush3.bf16.msra.mxu1 %v2263_v9 }
 0x14e   :  { %1805 = vmatprep.subr.bf16.mxu0 %v2267_v63  ;;  %1905 = vmatprep.subr.bf16.mxu1 %v2265_v60 }
 0x151   :  { %1807 = vmatpush3.bf16.msra.mxu0 %v2267_v63  ;;  %1907 = vmatpush3.bf16.msra.mxu1 %v2265_v60 }
 0x152   :  { %1809 = vmatprep.subr.bf16.mxu0 %v2269_v24  ;;  %1909 = vmatprep.subr.bf16.mxu1 %v2165_v34 }
 0x154   :  { %1687 = vmatmul.mubr.f32.vlgmr.msra.gmra.mrb[2].mxu1 %v2306_v38 }
 0x155   :  { %1811 = vmatpush3.bf16.msra.mxu0 %v2269_v24  ;;  %1911 = vmatpush3.bf16.msra.mxu1 %v2165_v34  ;;  %v1820_v34 = vpack.c.bf16 %v2304_v37, %v2299_v32 }
 0x156   :  { %1721 = vmatprep.mubr.f32.mxu1 %v2308_v50  ;;  %1813 = vmatprep.subr.bf16.mxu0 %v2271_v25 }
 0x157   :  { %1913 = vmatprep.subr.bf16.mxu1 %v2183_v41 }
 0x158   :  { %1582 = vmatmul.mubr.f32.vlgmr.msra.gmra.mrb[2].mxu0 %v2306_v38 }
 0x159   :  { %1815 = vmatpush3.bf16.msra.mxu0 %v2271_v25  ;;  %1616 = vmatprep.mubr.f32.mxu0 %v2328_v55 }
 0x15a   :  { %1915 = vmatpush3.bf16.msra.mxu1 %v2183_v41  ;;  %1817 = vmatprep.subr.bf16.mxu0 %v1816_v15 }
 0x15b   :  { %1917 = vmatprep.subr.bf16.mxu1 %v2197_v46 }
 0x15d   :  { %1819 = vmatpush3.bf16.msra.mxu0 %v1816_v15 }
 0x15e   :  { %1919 = vmatpush3.bf16.msra.mxu1 %v2197_v46  ;;  %1821 = vmatprep.subr.bf16.mxu0 %v1820_v34 }
 0x15f   :  { %1921 = vmatprep.subr.bf16.mxu1 %v2209_v49 }
 0x161   :  { %1823 = vmatpush3.bf16.msra.mxu0 %v1820_v34 }
 0x162   :  { %1923 = vmatpush3.bf16.msra.mxu1 %v2209_v49  ;;  %1825 = vmatprep.subr.bf16.mxu0 %v1824_v23  ;;  %v1339_v49 = vld [vmem:[%s2418_s4] ss:$0 sm:$0xff] }
 0x163   :  { %1925 = vmatprep.subr.bf16.mxu1 %v2219_v54 }
 0x165   :  { %1827 = vmatpush3.bf16.msra.mxu0 %v1824_v23 }
 0x166   :  { %1927 = vmatpush3.bf16.msra.mxu1 %v2219_v54  ;;  %1829 = vmatprep.subr.bf16.mxu0 %v2273_v1 }
 0x167   :  { %1929 = vmatprep.subr.bf16.mxu1 %v2225_v59 }
 0x169   :  { %1831 = vmatpush3.bf16.msra.mxu0 %v2273_v1 }
 0x16a   :  { %1931 = vmatpush3.bf16.msra.mxu1 %v2225_v59  ;;  %1833 = vmatprep.subr.bf16.mxu0 %v2275_v2 }
 0x16b   :  { %1933 = vmatprep.subr.bf16.mxu1 %v2231_v0 }
 0x16d   :  { %1835 = vmatpush3.bf16.msra.mxu0 %v2275_v2 }
 0x16e   :  { %1935 = vmatpush3.bf16.msra.mxu1 %v2231_v0  ;;  %1837 = vmatprep.subr.bf16.mxu0 %v2277_v3 }
 0x16f   :  { %1937 = vmatprep.subr.bf16.mxu1 %v2237_v5 }
 0x171   :  { %1839 = vmatpush3.bf16.msra.mxu0 %v2277_v3 }
 0x172   :  { %1939 = vmatpush3.bf16.msra.mxu1 %v2237_v5  ;;  %1841 = vmatprep.subr.bf16.mxu0 %v2279_v4 }
 0x175   :  { %1722 = vmatmul.mubr.f32.vlgmr.msra.gmra.mrb[2].mxu1 %v2306_v38  ;;  %1843 = vmatpush3.bf16.msra.mxu0 %v2279_v4 }
 0x178   :  { %1617 = vmatmul.mubr.f32.vlgmr.msra.gmra.mrb[2].mxu0 %v2314_v39 }
 0x248   :  { %v1723_v41 = vpop.f32.mrb[2].mxu1 }
 0x249   :  { %v1279_v46 = vpop.f32.mrb[3].mxu1 }
 0x24b   :  { %v1618_v54 = vpop.f32.mrb[2].mxu0 }
 0x24c   :  { %v1944_v59 = vadd.f32 %v1618_v54, %v1339_v49  ;;  %v963_v0 = vpop.f32.mrb[3].mxu0 }
 0x24d   :  { %v1946_v29 = vadd.f32 %v1339_v49, %v963_v0 }
 0x24e   :  { %v1945_v33 = vadd.f32 %v1944_v59, %v1723_v41 }
 0x24f   :  { %v1947_v5 = vadd.f32 %v1946_v29, %v1279_v46 }
 0x251   :  { %1289 = vxpose.xlu0.b32.start [1/2] (short) (narrow) %v1947_v5, 8 }
 0x255   :  { %1290 = vxpose.xlu0.b32.end [2/2] (short) (narrow) %v1945_v33, 8 }
 0x2d1   :  { %v1305_v56 = vpop.trf.xlu0 }
 0x2d2   :  { %1321 = vst.msk [vmem:[#allocation8] sm:$0xff] %vm73_vm0, %v1305_v56 }
 0x2d3   :  { %2048 = shalt.err (!%p2045_p0)
}
 0x2d4   :  { %s2049_s10 = scalar_lea.hbm %s2419_s5, 128 }
 0x2d5   :  { %p2050_p1 = scmp.ne.s32.totalorder %s2419_s5, %s2049_s10  ;;  %p2053_p2 = scmp.lt.u32.totalorder %s2049_s10, %s2419_s5 }
 0x2d7   :  { %p2055_p3 = pnand %p2053_p2, %p2050_p1 }
 0x2d9   :  { %2058 = shalt.err (!%p2055_p3)
}
 0x2da   :  { %1331 = dma.vmem_to_hbm [thread:$0]  %s1329_s7, 128, %s2419_s5, [#allocation4]  }
 0x2db   :  { %2063 = dma.done.wait [#allocation4], 128  }
 0x2dc   :  { %2064 = vsyncadd [#allocation4], 4294967168 }
 0x2dd   :  { %1335 = vsyncpa [#allocation3], 1 }
 0x2de   :  { %1336 = vsyncpa [#allocation6], 1 }
 0x2df   :  { %1337 = vsyncpa [#allocation4], 1 }

</bundles_post_ra>
